<compile_context>
chip_gen: v7x
topology: tpu7x:2x2x1
jax: 0.10.0
libtpu: 0.0.40
codegen_flags: <defaults>
</compile_context>

<pallas_src>
import functools

import jax
import jax.numpy as jnp
from jax.experimental import pallas as pl
from jax.experimental.pallas import tpu as pltpu

LANES = 128
SUBLANES = 8


def _is_v7x():
    try:
        kind = jax.devices()[0].device_kind.lower()
    except Exception:
        return False
    return "v7" in kind


def _qfocal_sum_kernel(pred_ref, true_ref, out_ref, *, gamma, alpha, tm, sub_rows,
                       m_rows, steps, n_splits, need_mask):
    # out_ref is a resident (SUBLANES, LANES) f32 accumulator per split: its block
    # index depends only on the split axis, so it stays in VMEM across the
    # reduction axis and is written back once per split.
    if n_splits > 1:
        i = pl.program_id(0)
        j = pl.program_id(1)
        blk = i * steps + j          # un-clamped logical block index (for masking)
    else:
        j = pl.program_id(0)
        blk = j

    @pl.when(j == 0)
    def _():
        out_ref[...] = jnp.zeros_like(out_ref)

    n_sub = tm // sub_rows
    row_base = blk * tm

    def compute_chunk(r0):
        x = pred_ref[pl.ds(r0, sub_rows), :].astype(jnp.float32)
        t = true_ref[pl.ds(r0, sub_rows), :].astype(jnp.float32)

        if need_mask:
            # Neutralize rows past the valid range BEFORE any transcendental so
            # garbage in the partial-block tail (possibly NaN/Inf) never enters the
            # arithmetic.  pred=0, true=0.5 => exactly zero loss.
            rid = row_base + r0 + jax.lax.broadcasted_iota(
                jnp.int32, (sub_rows, LANES), 0)
            valid = rid < m_rows
            x = jnp.where(valid, x, 0.0)
            t = jnp.where(valid, t, 0.5)

        # One exp shared by the softplus term of BCEWithLogits and by sigmoid.
        e = jnp.exp(-jnp.abs(x))                        # EUP: exp
        softplus = jnp.log1p(e)                         # EUP: log
        bce = jnp.maximum(x, 0.0) - x * t + softplus    # stable BCE-with-logits

        inv = 1.0 / (1.0 + e)                           # EUP: reciprocal
        pred_prob = jnp.where(x >= 0.0, inv, e * inv)   # == sigmoid(x)

        alpha_factor = (1.0 - alpha) + t * (2.0 * alpha - 1.0)
        m = jnp.abs(t - pred_prob)
        if gamma == 1.5:
            modulating = m * jnp.sqrt(m)                # EUP: sqrt; exact at m == 0
        elif gamma == 2.0:
            modulating = m * m
        elif gamma == 1.0:
            modulating = m
        else:
            # Tiny clamp avoids a -inf intermediate in pow's exp(g*log m) at m == 0;
            # contribution stays ~1e-45 (negligible).
            modulating = jnp.power(jnp.maximum(m, 1e-30), gamma)

        loss = bce * alpha_factor * modulating          # (sub_rows, LANES)

        # VPU-only partial reduction onto the vreg-shaped accumulator; the expensive
        # cross-lane reduce happens once in the wrapper.
        out_ref[...] += loss.reshape(
            sub_rows // SUBLANES, SUBLANES, LANES).sum(axis=0)

    if n_sub == 1:
        compute_chunk(0)
    else:
        def body(s, carry):
            compute_chunk(pl.multiple_of(s * sub_rows, sub_rows))
            return carry
        jax.lax.fori_loop(0, n_sub, body, 0, unroll=(n_sub <= 8))


def qfocal_loss(pred, true, gamma=1.5, alpha=0.25, reduction="mean",
                target_block_bytes=None, n_splits=None):
    """QFocalLoss forward (loss_fcn = BCEWithLogitsLoss, reduction='mean' default)."""
    assert pred.shape == true.shape, (pred.shape, true.shape)
    if not jnp.issubdtype(pred.dtype, jnp.floating):
        pred = pred.astype(jnp.float32)
    if not jnp.issubdtype(true.dtype, jnp.floating):
        true = true.astype(jnp.float32)
    if reduction not in ("mean", "sum"):
        # TODO(synk): reduction='none' (per-element loss map) would need a second
        # elementwise pallas_call output; mean/sum cover the module's default usage.
        raise NotImplementedError("reduction='none' not exposed by this wrapper")

    is_v7 = _is_v7x()

    n = pred.size
    pred_flat = pred.reshape(-1)
    true_flat = true.reshape(-1)

    p_item = pred_flat.dtype.itemsize
    t_item = true_flat.dtype.itemsize
    itemsize = max(p_item, t_item)
    row_align = 16 if min(p_item, t_item) < 4 else 8   # bf16 tiles are (16, 128)

    m_rows = -(-n // LANES)
    rows_phys = max(m_rows, row_align)                  # tiny inputs: >= one tile
    pad_elems = rows_phys * LANES - n
    if pad_elems:
        # Only lane-ragged (n % 128 != 0) or tiny inputs pay this copy.  Padded
        # elements (pred=0, true=0.5) contribute exactly zero loss.
        # TODO(synk): a fully copy-free lane-ragged path would need 1-D HBM refs +
        # manual DMA; the row-dimension tail is already handled copy-free in-kernel.
        pred_flat = jnp.concatenate(
            [pred_flat, jnp.zeros((pad_elems,), pred_flat.dtype)])
        true_flat = jnp.concatenate(
            [true_flat, jnp.full((pad_elems,), 0.5, true_flat.dtype)])
    m_rows = rows_phys

    pred2d = pred_flat.reshape(m_rows, LANES)   # contiguous reshape: no copy
    true2d = true_flat.reshape(m_rows, LANES)

    # Megacore split axis: only pays on multi-TensorCore chips (v7x).
    if n_splits is None:
        n_splits = 2 if (is_v7 and m_rows >= 2048) else 1
    n_splits = max(1, int(n_splits))
    if m_rows // n_splits < row_align:
        n_splits = 1

    # Row-tile sized by bytes: ~2 MiB/input (v5e/v6e), ~4 MiB/input (v7x).
    if target_block_bytes is None:
        target_block_bytes = (4 << 20) if is_v7 else (2 << 20)
    tm = min(max(row_align, target_block_bytes // (LANES * itemsize)),
             m_rows // n_splits)
    tm = max(row_align, (tm // row_align) * row_align)  # aligned and <= m_rows
    if tm > 512:
        tm = (tm // 512) * 512                          # multiple of compute sub-chunk
        sub_rows = 512
    else:
        sub_rows = tm

    steps = -(-m_rows // (n_splits * tm))
    total_blocks = n_splits * steps
    max_block = -(-m_rows // tm) - 1                    # last block starting in-bounds
    need_clamp = total_blocks - 1 > max_block           # only possible if n_splits > 1
    need_mask = (m_rows % tm != 0) or need_clamp

    kernel = functools.partial(
        _qfocal_sum_kernel, gamma=float(gamma), alpha=float(alpha),
        tm=tm, sub_rows=sub_rows, m_rows=m_rows, steps=steps,
        n_splits=n_splits, need_mask=need_mask)

    if n_splits > 1:
        grid = (n_splits, steps)

        def in_map(i, j):
            b = i * steps + j
            if need_clamp:
                # Clamp fully-OOB blocks to a valid index; their contribution is
                # zeroed by the in-kernel row mask (which uses the un-clamped index).
                b = jnp.minimum(b, max_block)
            return (b, 0)

        out_map = lambda i, j: (i, 0)
        # NOTE: "parallel" shards the split axis across v7x's two TensorCores; switch
        # to pltpu.CORE_PARALLEL if an xprof trace shows a single core doing all steps.
        dims = ("parallel", "arbitrary")
    else:
        grid = (steps,)
        in_map = lambda j: (j, 0)
        out_map = lambda j: (0, 0)
        dims = ("arbitrary",)

    # VMEM budget: 2 inputs x double-buffer x block bytes + bounded compute temps.
    block_bytes = tm * LANES * (p_item + t_item)
    vmem_needed = 2 * block_bytes + 16 * sub_rows * LANES * 4 + (1 << 20)
    vmem_cap = (56 << 20) if is_v7 else (100 << 20)
    vmem_limit = int(min(vmem_cap, max(32 << 20, 2 * vmem_needed)))

    partials = pl.pallas_call(
        kernel,
        out_shape=jax.ShapeDtypeStruct((n_splits * SUBLANES, LANES), jnp.float32),
        grid_spec=pltpu.PrefetchScalarGridSpec(
            num_scalar_prefetch=0,
            grid=grid,
            in_specs=[
                pl.BlockSpec((tm, LANES), in_map),
                pl.BlockSpec((tm, LANES), in_map),
            ],
            out_specs=pl.BlockSpec((SUBLANES, LANES), out_map),
        ),
        compiler_params=pltpu.CompilerParams(
            dimension_semantics=dims,
            vmem_limit_bytes=vmem_limit,
        ),
    )(pred2d, true2d)

    total = jnp.sum(partials)   # tiny (n_splits*8, 128) reduce on the XLA side
    if reduction == "mean":
        return total / jnp.float32(n)
    return total


def _reference(pred, true, gamma=1.5, alpha=0.25):
    x = pred.astype(jnp.float32)
    t = true.astype(jnp.float32)
    bce = jnp.maximum(x, 0.0) - x * t + jnp.log1p(jnp.exp(-jnp.abs(x)))
    p = jax.nn.sigmoid(x)
    af = t * alpha + (1.0 - t) * (1.0 - alpha)
    mf = jnp.abs(t - p) ** gamma
    return jnp.mean(bce * af * mf)


if __name__ == "__main__":
    key = jax.random.PRNGKey(0)
    k1, k2, k3, k4, k5, k6 = jax.random.split(key, 6)

    # 1) NCHW-style shape, binary targets (typical BCEWithLogits usage).
    pred = jax.random.normal(k1, (2, 4, 16, 16), dtype=jnp.float32)
    true = (jax.random.uniform(k2, (2, 4, 16, 16)) > 0.5).astype(jnp.float32)
    out = jax.block_until_ready(qfocal_loss(pred, true, reduction="mean"))
    ref = _reference(pred, true)
    assert jnp.allclose(out, ref, rtol=1e-5, atol=1e-6), (out, ref)
    out_s = jax.block_until_ready(qfocal_loss(pred, true, reduction="sum"))
    assert jnp.allclose(out_s, ref * pred.size, rtol=1e-5, atol=1e-3), (out_s,)

    # 2) Ragged size (n % 128 != 0): exercises the minimal zero-loss pad path.
    pred2 = jax.random.normal(k3, (3, 5, 7, 9), dtype=jnp.float32)
    true2 = jax.random.uniform(k4, (3, 5, 7, 9), dtype=jnp.float32)
    out2 = jax.block_until_ready(qfocal_loss(pred2, true2))
    ref2 = _reference(pred2, true2)
    assert jnp.allclose(out2, ref2, rtol=1e-5, atol=1e-6), (out2, ref2)

    # 3) bf16 inputs with n % 128 == 0 but rows % tm != 0: exercises the copy-free
    #    partial-block path with in-kernel row masking.
    pred3 = jax.random.normal(k5, (2, 4, 16, 20), dtype=jnp.float32).astype(jnp.bfloat16)
    true3 = (jax.random.uniform(k6, (2, 4, 16, 20)) > 0.5).astype(jnp.bfloat16)
    out3 = jax.block_until_ready(qfocal_loss(pred3, true3))
    ref3 = _reference(pred3, true3)
    assert jnp.allclose(out3, ref3, rtol=1e-5, atol=1e-6), (out3, ref3)

    print("KERNEL_OK")
</pallas_src>

<mosaic_0001>
module attributes {stable_mosaic.version = 11 : i64} {
  func.func @_qfocal_sum_kernel(%arg0: i32, %arg1: memref<16x128xf32, #tpu.memory_space<vmem>>, %arg2: memref<16x128xf32, #tpu.memory_space<vmem>>, %arg3: memref<8x128xf32, #tpu.memory_space<vmem>>) attributes {dimension_semantics = [#tpu.dimension_semantics<arbitrary>], iteration_bounds = array<i64: 1>, scalar_prefetch = 0 : i64, scratch_operands = 0 : i64, tpu.core_type = #tpu.core_type<tc>, window_params = [{transform_indices = @transform_0, window_bounds = array<i64: 16, 128>}, {transform_indices = @transform_1, window_bounds = array<i64: 16, 128>}, {pipeline_mode = #tpu.pipeline_mode<synchronous>, transform_indices = @transform_2, window_bounds = array<i64: 8, 128>}]} {
    %c0_i32 = arith.constant 0 : i32
    %0 = arith.cmpi eq, %arg0, %c0_i32 : i32
    %1 = arith.extui %0 : i1 to i32
    %c0_i32_0 = arith.constant 0 : i32
    %2 = arith.cmpi ne, %1, %c0_i32_0 : i32
    scf.if %2 {
      %cst_15 = arith.constant 0.000000e+00 : f32
      %38 = vector.broadcast %cst_15 : f32 to vector<8x128xf32>
      %c0_16 = arith.constant 0 : index
      %c0_17 = arith.constant 0 : index
      %39 = vector.load %arg3[%c0_16, %c0_17] : memref<8x128xf32, #tpu.memory_space<vmem>>, vector<8x128xf32>
      tpu.vector_store %arg3[%c0_16, %c0_17], %38 {strides = array<i32>} : memref<8x128xf32, #tpu.memory_space<vmem>>, vector<8x128xf32>,
    } else {
    }
    %c0 = arith.constant 0 : index
    %c0_1 = arith.constant 0 : index
    %3 = vector.load %arg1[%c0, %c0_1] : memref<16x128xf32, #tpu.memory_space<vmem>>, vector<16x128xf32>
    %c0_2 = arith.constant 0 : index
    %c0_3 = arith.constant 0 : index
    %4 = vector.load %arg2[%c0_2, %c0_3] : memref<16x128xf32, #tpu.memory_space<vmem>>, vector<16x128xf32>
    %5 = math.absf %3 : vector<16x128xf32>
    %cst = arith.constant 0.000000e+00 : f32
    %6 = vector.broadcast %cst : f32 to vector<16x128xf32>
    %7 = arith.subf %6, %5 : vector<16x128xf32>
    %8 = math.exp %7 : vector<16x128xf32>
    %9 = math.log1p %8 : vector<16x128xf32>
    %cst_4 = arith.constant 0.000000e+00 : f32
    %10 = vector.broadcast %cst_4 : f32 to vector<16x128xf32>
    %11 = arith.maximumf %3, %10 : vector<16x128xf32>
    %12 = arith.mulf %3, %4 : vector<16x128xf32>
    %13 = arith.subf %11, %12 : vector<16x128xf32>
    %14 = arith.addf %13, %9 : vector<16x128xf32>
    %cst_5 = arith.constant 1.000000e+00 : f32
    %15 = vector.broadcast %cst_5 : f32 to vector<16x128xf32>
    %16 = arith.addf %15, %8 : vector<16x128xf32>
    %cst_6 = arith.constant 1.000000e+00 : f32
    %17 = vector.broadcast %cst_6 : f32 to vector<16x128xf32>
    %18 = arith.divf %17, %16 : vector<16x128xf32>
    %cst_7 = arith.constant 0.000000e+00 : f32
    %19 = vector.broadcast %cst_7 : f32 to vector<16x128xf32>
    %20 = arith.cmpf oge, %3, %19 : vector<16x128xf32>
    %21 = arith.mulf %8, %18 : vector<16x128xf32>
    %22 = arith.select %20, %18, %21 : vector<16x128xi1>, vector<16x128xf32>
    %cst_8 = arith.constant -5.000000e-01 : f32
    %23 = vector.broadcast %cst_8 : f32 to vector<16x128xf32>
    %24 = arith.mulf %4, %23 : vector<16x128xf32>
    %cst_9 = arith.constant 7.500000e-01 : f32
    %25 = vector.broadcast %cst_9 : f32 to vector<16x128xf32>
    %26 = arith.addf %25, %24 : vector<16x128xf32>
    %27 = arith.subf %4, %22 : vector<16x128xf32>
    %28 = math.absf %27 : vector<16x128xf32>
    %29 = math.sqrt %28 : vector<16x128xf32>
    %30 = arith.mulf %28, %29 : vector<16x128xf32>
    %31 = arith.mulf %14, %26 : vector<16x128xf32>
    %32 = arith.mulf %31, %30 : vector<16x128xf32>
    %c0_10 = arith.constant 0 : index
    %c0_11 = arith.constant 0 : index
    %33 = vector.load %arg3[%c0_10, %c0_11] : memref<8x128xf32, #tpu.memory_space<vmem>>, vector<8x128xf32>
    %34 = vector.shape_cast %32 : vector<16x128xf32> to vector<2x8x128xf32>
    %cst_12 = arith.constant dense<0.000000e+00> : vector<8x128xf32>
    %35 = vector.multi_reduction <add>, %34, %cst_12 [0] : vector<2x8x128xf32> to vector<8x128xf32>
    %36 = arith.addf %33, %35 : vector<8x128xf32>
    %c0_13 = arith.constant 0 : index
    %c0_14 = arith.constant 0 : index
    %37 = vector.load %arg3[%c0_13, %c0_14] : memref<8x128xf32, #tpu.memory_space<vmem>>, vector<8x128xf32>
    tpu.vector_store %arg3[%c0_13, %c0_14], %36 {strides = array<i32>} : memref<8x128xf32, #tpu.memory_space<vmem>>, vector<8x128xf32>,
    return
  }
  func.func @transform_0(%arg0: i32) -> (i32, i32) {
    %c0_i32 = arith.constant 0 : i32
    %c0_i32_0 = arith.constant 0 : i32
    return %arg0, %c0_i32 : i32, i32
  }
  func.func @transform_1(%arg0: i32) -> (i32, i32) {
    %c0_i32 = arith.constant 0 : i32
    %c0_i32_0 = arith.constant 0 : i32
    return %arg0, %c0_i32 : i32, i32
  }
  func.func @transform_2(%arg0: i32) -> (i32, i32) {
    %c0_i32 = arith.constant 0 : i32
    %c0_i32_0 = arith.constant 0 : i32
    %c0_i32_1 = arith.constant 0 : i32
    return %c0_i32, %c0_i32_0 : i32, i32
  }
}

</mosaic_0001>

<bundles_post_ra>
// kernel: tpu_custom_call.1
= control target key start
LH: loop header
LB: loop body
LE: loop exit
PB: predicated region body
PF: predicated region fallthrough
CT: control target
= control target key end

     0   :  { %7 = vsyncpa [#allocation3], 0  ;;  %s293_s0 = inlined_call_operand.hbm [shape: f32[16,128], index: 0, kind: input, shape index: {}]   ;;  %s294_s1 = inlined_call_operand.hbm [shape: f32[16,128], index: 1, kind: input, shape index: {}]   ;;  %s295_s2 = inlined_call_operand.hbm [shape: f32[8,128], index: 2, kind: output, shape index: {}]  }
   0x1   :  { %8 = vsyncpa [#allocation6], 0 }
   0x2   :  { %9 = vsyncpa [#allocation4], 0  ;;  %s237_s9 = smov [#allocation2]   ;;  %s165_s13 = scalar_lea.hbm %s293_s0, 256 }
   0x3   :  { %s15_s10 = sshll.u32 %s237_s9, 4  ;;  %p166_p0 = scmp.ne.s32.totalorder %s293_s0, %s165_s13  ;;  %s16_s10 = int_to_ptr.vmem [resolvable:$true] %s15_s10 }
   0x4   :  { %p169_p1 = scmp.lt.u32.totalorder %s165_s13, %s293_s0 }
   0x6   :  { %p171_p2 = pnand %p169_p1, %p166_p0 }
   0x8   :  { %174 = shalt.err (!%p171_p2)
}
   0x9   :  { %s175_s18 = scalar_lea.vmem %s16_s10, 256  ;;  %p180_p4 = scmp.lt.s32.totalorder %s16_s10, %s16_s10 }
   0xa   :  { %p176_p3 = scmp.ne.s32.totalorder %s16_s10, %s175_s18  ;;  %p181_p5 = scmp.lt.s32.totalorder %s175_s18, %s175_s18 }
   0xc   :  { %p182_p6 = por %p181_p5, %p180_p4 }
   0xe   :  { %p183_p7 = pnand %p182_p6, %p176_p3 }
  0x10   :  { %186 = shalt.err (!%p183_p7)
}
  0x11   :  { %s238_s19 = smov 128   ;;  %s239_s20 = smov 8  }
  0x12   :  { %21 = dma.hbm_to_vmem [thread:$0]  %s293_s0, 256, %s16_s10, [#allocation3], %s238_s19, %s238_s19, %s239_s20  }
  0x13   :  { %s240_s23 = smov [#allocation5]   ;;  %s187_s27 = scalar_lea.hbm %s294_s1, 256 }
  0x14   :  { %s27_s24 = sshll.u32 %s240_s23, 4  ;;  %p188_p8 = scmp.ne.s32.totalorder %s294_s1, %s187_s27  ;;  %s28_s24 = int_to_ptr.vmem [resolvable:$true] %s27_s24 }
  0x15   :  { %p191_p9 = scmp.lt.u32.totalorder %s187_s27, %s294_s1 }
  0x17   :  { %p193_p10 = pnand %p191_p9, %p188_p8 }
  0x19   :  { %196 = shalt.err (!%p193_p10)
}
  0x1a   :  { %s197_s4 = scalar_lea.vmem %s28_s24, 256  ;;  %p202_p12 = scmp.lt.s32.totalorder %s28_s24, %s28_s24 }
  0x1b   :  { %p198_p11 = scmp.ne.s32.totalorder %s28_s24, %s197_s4  ;;  %p203_p13 = scmp.lt.s32.totalorder %s197_s4, %s197_s4 }
  0x1d   :  { %p204_p0 = por %p203_p13, %p202_p12 }
  0x1f   :  { %p205_p1 = pnand %p204_p0, %p198_p11 }
  0x21   :  { %208 = shalt.err (!%p205_p1)
}
  0x22   :  { %33 = dma.hbm_to_vmem [thread:$0]  %s294_s1, 256, %s28_s24, [#allocation6], %s238_s19, %s238_s19, %s239_s20  }
  0x23   :  { %231 = dma.done.wait [#allocation3], 256  }
  0x24   :  { %232 = vsyncadd [#allocation3], 4294967040 }
  0x25   :  { %233 = dma.done.wait [#allocation6], 256  }
  0x26   :  { %234 = vsyncadd [#allocation6], 4294967040  ;;  %v45_v0 = vld [vmem:[#allocation2] sm:$0xff]  ;;  %v46_v1 = vld [vmem:[#allocation2 + $0x8] sm:$0xff]  ;;  %s241_s1 = smov [#allocation7]  }
  0x27   :  { %v49_v2 = vand.u32 2147483647, %v45_v0  ;;  %v50_v3 = vand.u32 2147483647, %v46_v1  ;;  %vm89_vm0 = vcmp.ge.f32.partialorder %v45_v0, 0.0  ;;  %v47_v14 = vld [vmem:[#allocation5] sm:$0xff] }
  0x28   :  { %vm90_vm1 = vcmp.ge.f32.partialorder %v46_v1, 0.0  ;;  %v48_v16 = vld [vmem:[#allocation5 + $0x8] sm:$0xff]  ;;  %v75_v32 = vmax.f32 %v45_v0, 0.0  ;;  %v77_v33 = vmul.f32 %v47_v14, %v45_v0  ;;  %v76_v36 = vmax.f32 %v46_v1, 0.0  ;;  %s133_s6 = sshll.u32 %s241_s1, 4  ;;  %s134_s6 = int_to_ptr.vmem [resolvable:$true] %s133_s6 }
  0x29   :  { %v51_v4 = vsub.f32 0.0, %v49_v2  ;;  %v52_v5 = vsub.f32 0.0, %v50_v3  ;;  %v78_v37 = vmul.f32 %v48_v16, %v46_v1  ;;  %v95_v41 = vmul.f32 -0.5, %v47_v14  ;;  %s209_s7 = scalar_lea.vmem %s134_s6, 128  ;;  %p214_p3 = scmp.lt.s32.totalorder %s134_s6, %s134_s6 }
  0x2a   :  { %v79_v40 = vsub.f32 %v75_v32, %v77_v33  ;;  %v96_v44 = vmul.f32 -0.5, %v48_v16  ;;  %p210_p2 = scmp.ne.s32.totalorder %s134_s6, %s209_s7  ;;  %p215_p4 = scmp.lt.s32.totalorder %s209_s7, %s209_s7 }
  0x2b   :  { %v53_v6 = vmul.f32 1.442695, %v51_v4  ;;  %v55_v7 = vmul.f32 1.442695, %v52_v5  ;;  %v80_v43 = vsub.f32 %v76_v36, %v78_v37  ;;  %v97_v47 = vadd.f32 0.75, %v95_v41 }
  0x2c   :  { %v98_v50 = vadd.f32 0.75, %v96_v44  ;;  %p216_p5 = por %p215_p4, %p214_p3 }
  0x2d   :  { %149 = vpow2.f32 %v53_v6 }
  0x2e   :  { %151 = vpow2.f32 %v55_v7  ;;  %p217_p6 = pnand %p216_p5, %p210_p2 }
  0x37   :  { %v150_v8 = vpop.eup %149 }
  0x38   :  { %v152_v9 = vpop.eup %151  ;;  %v57_v10 = vadd.f32 1.0, %v150_v8  ;;  %v60_v17 = vmul.f32 -0.5, %v150_v8  ;;  %v63_v27 = vand.u32 2147483647, %v150_v8 }
  0x39   :  { %v66_v11 = vadd.f32 1.0, %v152_v9  ;;  %v69_v19 = vmul.f32 -0.5, %v152_v9  ;;  %v72_v31 = vand.u32 2147483647, %v152_v9 }
  0x3a   :  { %153 = vrcp.f32 %v57_v10  ;;  %v61_v24 = vadd.f32 1.0, %v60_v17  ;;  %vm64_vm2 = vcmp.lt.f32.partialorder %v63_v27, 0.0004427343 }
  0x3b   :  { %155 = vrcp.f32 %v66_v11  ;;  %v70_v28 = vadd.f32 1.0, %v69_v19  ;;  %vm73_vm3 = vcmp.lt.f32.partialorder %v72_v31, 0.0004427343 }
  0x3c   :  { %157 = vlog2.f32 %v57_v10  ;;  %v62_v35 = vmul.f32 %v150_v8, %v61_v24 }
  0x3d   :  { %159 = vlog2.f32 %v66_v11  ;;  %v71_v39 = vmul.f32 %v152_v9, %v70_v28 }
  0x44   :  { %v154_v12 = vpop.eup %153 }
  0x45   :  { %v156_v13 = vpop.eup %155  ;;  %v91_v15 = vmul.f32 %v154_v12, %v150_v8 }
  0x46   :  { %v92_v18 = vmul.f32 %v156_v13, %v152_v9  ;;  %v158_v26 = vpop.eup %157 }
  0x47   :  { %v93_v20 = vsel %vm89_vm0, %v154_v12, %v91_v15  ;;  %v160_v30 = vpop.eup %159  ;;  %v59_v34 = vmul.f32 0.6931472, %v158_v26 }
  0x48   :  { %v94_v21 = vsel %vm90_vm1, %v156_v13, %v92_v18  ;;  %v99_v22 = vsub.f32 %v47_v14, %v93_v20  ;;  %v68_v38 = vmul.f32 0.6931472, %v160_v30 }
  0x49   :  { %v100_v23 = vsub.f32 %v48_v16, %v94_v21  ;;  %v65_v42 = vsel %vm64_vm2, %v62_v35, %v59_v34 }
  0x4a   :  { %v101_v25 = vand.u32 2147483647, %v99_v22  ;;  %v74_v45 = vsel %vm73_vm3, %v71_v39, %v68_v38  ;;  %v81_v46 = vadd.f32 %v79_v40, %v65_v42 }
  0x4b   :  { %v102_v29 = vand.u32 2147483647, %v100_v23  ;;  %v82_v49 = vadd.f32 %v80_v43, %v74_v45 }
  0x4c   :  { %161 = vrsqrt.f32 %v101_v25  ;;  %vm105_vm4 = vcmp.eq.f32.partialorder %v101_v25, inf  ;;  %v108_v51 = vand.u32 2147483648, %v101_v25  ;;  %vm107_vm5 = vcmp.eq.f32.partialorder %v101_v25, 0.0 }
  0x4d   :  { %163 = vrsqrt.f32 %v102_v29  ;;  %vm112_vm6 = vcmp.eq.f32.partialorder %v102_v29, inf  ;;  %v115_v54 = vand.u32 2147483648, %v102_v29  ;;  %vm114_vm7 = vcmp.eq.f32.partialorder %v102_v29, 0.0 }
  0x4e   :  { %v119_v57 = vmul.f32 %v97_v47, %v81_v46  ;;  %v120_v60 = vmul.f32 %v98_v50, %v82_v49 }
  0x56   :  { %v162_v48 = vpop.eup %161 }
  0x57   :  { %v164_v52 = vpop.eup %163  ;;  %v104_v53 = vmul.f32 %v162_v48, %v101_v25 }
  0x58   :  { %v111_v55 = vmul.f32 %v164_v52, %v102_v29 }
  0x59   :  { %v106_v56 = vsel %vm105_vm4, %v101_v25, %v104_v53 }
  0x5a   :  { %v109_v58 = vsel %vm107_vm5, %v108_v51, %v106_v56  ;;  %v113_v59 = vsel %vm112_vm6, %v102_v29, %v111_v55 }
  0x5b   :  { %v116_v61 = vsel %vm114_vm7, %v115_v54, %v113_v59  ;;  %v117_v62 = vmul.f32 %v109_v58, %v101_v25 }
  0x5c   :  { %v118_v63 = vmul.f32 %v116_v61, %v102_v29 }
  0x5d   :  { %v121_v0 = vmul.f32 %v119_v57, %v117_v62 }
  0x5e   :  { %v122_v1 = vmul.f32 %v120_v60, %v118_v63 }
  0x60   :  { %v124_v2 = vadd.f32 %v122_v1, %v121_v0 }
  0x62   :  { %126 = vst [vmem:[#allocation7] sm:$0xff] %v124_v2 }
  0x63   :  { %220 = shalt.err (!%p217_p6)
}
  0x64   :  { %s221_s10 = scalar_lea.hbm %s295_s2, 128 }
  0x65   :  { %p222_p7 = scmp.ne.s32.totalorder %s295_s2, %s221_s10  ;;  %p225_p8 = scmp.lt.u32.totalorder %s221_s10, %s295_s2 }
  0x67   :  { %p227_p9 = pnand %p225_p8, %p222_p7 }
  0x69   :  { %230 = shalt.err (!%p227_p9)
}
  0x6a   :  { %136 = dma.vmem_to_hbm [thread:$0]  %s134_s6, 128, %s295_s2, [#allocation4]  }
  0x6b   :  { %235 = dma.done.wait [#allocation4], 128  }
  0x6c   :  { %236 = vsyncadd [#allocation4], 4294967168 }
  0x6d   :  { %140 = vsyncpa [#allocation3], 1 }
  0x6e   :  { %141 = vsyncpa [#allocation6], 1 }
  0x6f   :  { %142 = vsyncpa [#allocation4], 1 }

</bundles_post_ra>
